<compile_context>
chip_gen: v5e
topology: v5e:2x2
jax: 0.10.0
libtpu: 0.0.40
codegen_flags: <defaults>
</compile_context>

<pallas_src>
import functools

import jax
import jax.numpy as jnp
from jax.experimental import pallas as pl
from jax.experimental.pallas import tpu as pltpu


def _window_attention_kernel(x_ref, wqkv_ref, bqkv_ref, wproj_ref, bproj_ref,
                             bias_ref, out_ref, out2_ref, *,
                             scale, num_heads, tokens_per_window):
    # x_ref    : (M, C)    M = block_windows * N (whole windows per block)
    # wqkv_ref : (C, 3C)   = Wqkv^T  (lane-dense, resident across grid steps)
    # bqkv_ref : (1, 3C)
    # wproj_ref: (C, C)    = Wproj^T (resident)
    # bproj_ref: (1, C)
    # bias_ref : (H, N, N) relative position bias (pre-gathered, resident)
    # out_ref  : (M, C)
    # out2_ref : (M, C) f32 VMEM scratch: assembled per-head attention output
    M, C = x_ref.shape
    N = tokens_per_window
    H = num_heads
    hd = C // H
    Bblk = M // N

    x2 = x_ref[...]                                   # native dtype -> MXU
    # Fused, lane-dense QKV projection; f32 accumulation on the MXU.
    qkv = jnp.dot(x2, wqkv_ref[...], preferred_element_type=jnp.float32)
    qkv = qkv + bqkv_ref[...].astype(jnp.float32)     # (M, 3C)

    # Small per-head attention core (N x N scores).  The projections above /
    # below carry the FLOPs; this loop only does the cheap softmax'd attention.
    # TODO(synk): optional shifted-window attention mask (mask != None) not implemented.
    for h in range(H):                                # static unroll, H is small
        q = (qkv[:, h * hd:(h + 1) * hd] * scale).reshape(Bblk, N, hd)
        k = qkv[:, C + h * hd:C + (h + 1) * hd].reshape(Bblk, N, hd)
        v = qkv[:, 2 * C + h * hd:2 * C + (h + 1) * hd].reshape(Bblk, N, hd)

        s = jnp.einsum('bqd,bkd->bqk', q, k,
                       preferred_element_type=jnp.float32)
        s = s + bias_ref[h][None].astype(jnp.float32)

        # Numerically-stable softmax; normalization deferred past P@V.
        s = s - jnp.max(s, axis=-1, keepdims=True)
        p = jnp.exp(s)
        denom = jnp.sum(p, axis=-1, keepdims=True)    # (Bblk, N, 1)

        o = jnp.einsum('bqk,bkd->bqd', p.astype(v.dtype), v,
                       preferred_element_type=jnp.float32)
        inv = pl.reciprocal(denom, approx=True)       # EUP slot (cheap)
        inv = inv * (2.0 - denom * inv)               # one Newton step -> f32 accuracy
        o = o * inv                                   # (Bblk, N, hd)

        # Fold the head concat into the scratch slab columns.
        out2_ref[:, h * hd:(h + 1) * hd] = o.reshape(M, hd)

    # Output projection as ONE full-K matmul (head concat already assembled).
    out2 = out2_ref[...]
    y = jnp.dot(out2.astype(wproj_ref.dtype), wproj_ref[...],
                preferred_element_type=jnp.float32)
    y = y + bproj_ref[...].astype(jnp.float32)
    out_ref[...] = y.astype(out_ref.dtype)


def make_relative_position_index(window_size):
    Wh, Ww = window_size
    coords = jnp.stack(jnp.meshgrid(jnp.arange(Wh), jnp.arange(Ww),
                                    indexing='ij'))            # (2, Wh, Ww)
    coords_flatten = coords.reshape(2, -1)                     # (2, N)
    rel = coords_flatten[:, :, None] - coords_flatten[:, None, :]   # (2, N, N)
    rel = rel.transpose(1, 2, 0)                               # (N, N, 2)
    rel = rel.at[:, :, 0].add(Wh - 1)
    rel = rel.at[:, :, 1].add(Ww - 1)
    rel = rel.at[:, :, 0].multiply(2 * Ww - 1)
    return rel.sum(-1)                                         # (N, N) int32


def _choose_block_windows(B_, N, C, itemsize):
    """Windows per grid step from a VMEM budget + grid-depth rule."""
    # Conservative per-step budget so the same tiling also fits v7x
    # (64 MiB physical / 32 MiB default-scoped VMEM per TensorCore).
    vmem_budget = 6 * 1024 * 1024

    def step_bytes(bw):
        M = bw * N
        io = 2 * 2 * M * C * itemsize                 # x + out blocks, double-buffered
        f32 = 4
        # qkv + q/k/v/score/out temporaries + out2 scratch, all f32.
        scratch = (3 * M * C + 3 * M * C + bw * N * N + 2 * M * C) * f32
        return io + scratch

    divisors = [d for d in range(1, B_ + 1) if B_ % d == 0]
    # Keep block rows a multiple of 8 (sublane tile) unless it is the full array.
    aligned = [d for d in divisors if (d * N) % 8 == 0 or d == B_]
    divisors = aligned or divisors

    fits = [d for d in divisors if step_bytes(d) <= vmem_budget] or [divisors[0]]
    # Prefer >= ~8 grid steps (and an even count) so the software pipeline has
    # iterations to overlap DMA with compute and v7x's two TensorCores both get
    # work; among those take the largest block (best MXU row fill).
    deep = [d for d in fits if B_ // d >= min(8, B_)]
    even = [d for d in deep if (B_ // d) % 2 == 0]
    for cand in (even, deep, fits):
        if cand:
            return cand[-1]
    return 1


def window_attention_forward(x, w_qkv, b_qkv, w_proj, b_proj,
                             rel_pos_bias_table, rel_pos_index, num_heads,
                             block_windows=None, qk_scale=None):
    """x: (B_, N, C); w_qkv: (3C, C); b_qkv: (3C,); w_proj: (C, C);
    b_proj: (C,); rel_pos_bias_table: ((2Wh-1)(2Ww-1), H); rel_pos_index: (N, N)."""
    B_, N, C = x.shape
    H = num_heads
    hd = C // H
    scale = qk_scale if qk_scale is not None else hd ** -0.5

    # Tiny, parameter-only gather done once outside the kernel: (H, N, N).
    rel_bias = rel_pos_bias_table[rel_pos_index.reshape(-1)]       # (N*N, H)
    rel_bias = rel_bias.reshape(N, N, H).transpose(2, 0, 1)        # (H, N, N)
    rel_bias = rel_bias.astype(jnp.float32)

    # Lane-dense, pre-transposed parameters (the kernel never transposes).
    wqkv_t = jnp.swapaxes(w_qkv, 0, 1)                             # (C, 3C)
    bqkv_r = b_qkv.reshape(1, 3 * C)
    wproj_t = jnp.swapaxes(w_proj, 0, 1)                           # (C, C)
    bproj_r = b_proj.reshape(1, C)

    if block_windows is None:
        block_windows = _choose_block_windows(B_, N, C, x.dtype.itemsize)
    assert B_ % block_windows == 0
    block_rows = block_windows * N
    grid = (B_ // block_windows,)

    # Lane-dense 2-D I/O slabs: (B_*N, C); reshaped back outside pallas_call.
    x2d = x.reshape(B_ * N, C)

    kernel = functools.partial(_window_attention_kernel, scale=scale,
                               num_heads=H, tokens_per_window=N)

    y2d = pl.pallas_call(
        kernel,
        out_shape=jax.ShapeDtypeStruct((B_ * N, C), x.dtype),
        grid_spec=pltpu.PrefetchScalarGridSpec(
            num_scalar_prefetch=0,
            grid=grid,
            in_specs=[
                pl.BlockSpec((block_rows, C), lambda i: (i, 0)),
                # Parameters: constant index_map -> stay resident in VMEM.
                pl.BlockSpec((C, 3 * C), lambda i: (0, 0)),
                pl.BlockSpec((1, 3 * C), lambda i: (0, 0)),
                pl.BlockSpec((C, C), lambda i: (0, 0)),
                pl.BlockSpec((1, C), lambda i: (0, 0)),
                pl.BlockSpec((H, N, N), lambda i: (0, 0, 0)),
            ],
            out_specs=pl.BlockSpec((block_rows, C), lambda i: (i, 0)),
            scratch_shapes=[pltpu.VMEM((block_rows, C), jnp.float32)],
        ),
        compiler_params=pltpu.CompilerParams(
            dimension_semantics=("parallel",)),
    )(x2d, wqkv_t, bqkv_r, wproj_t, bproj_r, rel_bias)

    return y2d.reshape(B_, N, C)


def reference_forward(x, w_qkv, b_qkv, w_proj, b_proj,
                      rel_pos_bias_table, rel_pos_index, num_heads,
                      qk_scale=None):
    """Pure-JAX reference of WindowAttention.forward (mask=None, eval mode)."""
    B_, N, C = x.shape
    H = num_heads
    hd = C // H
    scale = qk_scale if qk_scale is not None else hd ** -0.5

    qkv = x @ w_qkv.T + b_qkv                                  # (B_, N, 3C)
    qkv = qkv.reshape(B_, N, 3, H, hd).transpose(2, 0, 3, 1, 4)
    q, k, v = qkv[0], qkv[1], qkv[2]                           # (B_, H, N, hd)
    q = q * scale
    attn = q @ jnp.swapaxes(k, -2, -1)                         # (B_, H, N, N)
    rel_bias = rel_pos_bias_table[rel_pos_index.reshape(-1)]
    rel_bias = rel_bias.reshape(N, N, H).transpose(2, 0, 1)    # (H, N, N)
    attn = attn + rel_bias[None]
    attn = jax.nn.softmax(attn, axis=-1)
    out = attn @ v                                             # (B_, H, N, hd)
    out = out.transpose(0, 2, 1, 3).reshape(B_, N, C)
    return out @ w_proj.T + b_proj


if __name__ == "__main__":
    num_heads = 4
    window_size = (4, 4)
    C = 32
    N = window_size[0] * window_size[1]   # 16
    B_ = 8                                # num_windows * batch

    key = jax.random.PRNGKey(0)
    kx, kq, kbq, kp, kbp, kt = jax.random.split(key, 6)

    x = jax.random.normal(kx, (B_, N, C), dtype=jnp.float32)
    bound = 1.0 / (C ** 0.5)
    w_qkv = jax.random.uniform(kq, (3 * C, C), jnp.float32, -bound, bound)
    b_qkv = jax.random.uniform(kbq, (3 * C,), jnp.float32, -bound, bound)
    w_proj = jax.random.uniform(kp, (C, C), jnp.float32, -bound, bound)
    b_proj = jax.random.uniform(kbp, (C,), jnp.float32, -bound, bound)
    n_rel = (2 * window_size[0] - 1) * (2 * window_size[1] - 1)
    table = 0.02 * jax.random.normal(kt, (n_rel, num_heads), jnp.float32)

    rel_idx = make_relative_position_index(window_size)

    out = window_attention_forward(x, w_qkv, b_qkv, w_proj, b_proj,
                                   table, rel_idx, num_heads)
    out = jax.block_until_ready(out)

    ref = reference_forward(x, w_qkv, b_qkv, w_proj, b_proj,
                            table, rel_idx, num_heads)
    max_err = float(jnp.max(jnp.abs(out - ref)))
    # Slightly relaxed tolerance: approx EUP reciprocal + one Newton step is
    # ~f32 accurate but not bit-identical to an exact divide.
    assert jnp.allclose(out, ref, atol=5e-4, rtol=5e-4), max_err

    print("KERNEL_OK")
</pallas_src>

<mosaic_0001>
module attributes {stable_mosaic.version = 11 : i64} {
  func.func @_window_attention_kernel(%arg0: i32, %arg1: memref<16x32xf32, #tpu.memory_space<vmem>>, %arg2: memref<32x96xf32, #tpu.memory_space<vmem>>, %arg3: memref<1x96xf32, #tpu.memory_space<vmem>>, %arg4: memref<32x32xf32, #tpu.memory_space<vmem>>, %arg5: memref<1x32xf32, #tpu.memory_space<vmem>>, %arg6: memref<4x16x16xf32, #tpu.memory_space<vmem>>, %arg7: memref<16x32xf32, #tpu.memory_space<vmem>>, %arg8: memref<16x32xf32, #tpu.memory_space<vmem>>) attributes {dimension_semantics = [#tpu.dimension_semantics<parallel>], iteration_bounds = array<i64: 8>, scalar_prefetch = 0 : i64, scratch_operands = 1 : i64, tpu.core_type = #tpu.core_type<tc>, window_params = [{transform_indices = @transform_0, window_bounds = array<i64: 16, 32>}, {pipeline_mode = #tpu.pipeline_mode<synchronous>, transform_indices = @transform_1, window_bounds = array<i64: 32, 96>}, {pipeline_mode = #tpu.pipeline_mode<synchronous>, transform_indices = @transform_2, window_bounds = array<i64: 1, 96>}, {pipeline_mode = #tpu.pipeline_mode<synchronous>, transform_indices = @transform_3, window_bounds = array<i64: 32, 32>}, {pipeline_mode = #tpu.pipeline_mode<synchronous>, transform_indices = @transform_4, window_bounds = array<i64: 1, 32>}, {pipeline_mode = #tpu.pipeline_mode<synchronous>, transform_indices = @transform_5, window_bounds = array<i64: 4, 16, 16>}, {transform_indices = @transform_6, window_bounds = array<i64: 16, 32>}]} {
    %c0 = arith.constant 0 : index
    %c0_0 = arith.constant 0 : index
    %0 = vector.load %arg1[%c0, %c0_0] : memref<16x32xf32, #tpu.memory_space<vmem>>, vector<16x32xf32>
    %c0_1 = arith.constant 0 : index
    %c0_2 = arith.constant 0 : index
    %1 = vector.load %arg2[%c0_1, %c0_2] : memref<32x96xf32, #tpu.memory_space<vmem>>, vector<32x96xf32>
    %cst = arith.constant dense<0.000000e+00> : vector<16x96xf32>
    %2 = tpu.matmul %0, %1, %cst {dimension_numbers = #tpu.dot_dimension_numbers<[1], [0], [0], [1], [0, 0, 1, 1], [], []>} : vector<16x32xf32>, vector<32x96xf32>, vector<16x96xf32> -> vector<16x96xf32>
    %c0_3 = arith.constant 0 : index
    %c0_4 = arith.constant 0 : index
    %3 = vector.load %arg3[%c0_3, %c0_4] : memref<1x96xf32, #tpu.memory_space<vmem>>, vector<1x96xf32>
    %4 = vector.broadcast %3 : vector<1x96xf32> to vector<16x96xf32>
    %5 = arith.addf %2, %4 : vector<16x96xf32>
    %6 = vector.extract_strided_slice %5 {offsets = [0, 0], sizes = [16, 8], strides = [1, 1]} : vector<16x96xf32> to vector<16x8xf32>
    %cst_5 = arith.constant 0.353553385 : f32
    %7 = vector.broadcast %cst_5 : f32 to vector<16x8xf32>
    %8 = arith.mulf %6, %7 : vector<16x8xf32>
    %9 = vector.shape_cast %8 : vector<16x8xf32> to vector<1x16x8xf32>
    %10 = vector.extract_strided_slice %5 {offsets = [0, 32], sizes = [16, 8], strides = [1, 1]} : vector<16x96xf32> to vector<16x8xf32>
    %11 = vector.shape_cast %10 : vector<16x8xf32> to vector<1x16x8xf32>
    %12 = vector.extract_strided_slice %5 {offsets = [0, 64], sizes = [16, 8], strides = [1, 1]} : vector<16x96xf32> to vector<16x8xf32>
    %13 = vector.shape_cast %12 : vector<16x8xf32> to vector<1x16x8xf32>
    "tpu.trace_start"() <{level = 10 : i32, message = "bqd,bkd->bqk"}> : () -> ()
    %cst_6 = arith.constant dense<0.000000e+00> : vector<1x16x16xf32>
    %14 = tpu.matmul %9, %11, %cst_6 {dimension_numbers = #tpu.dot_dimension_numbers<[2], [2], [1], [1], [0, 0, 0, 1, 1, 1], [0], [0]>} : vector<1x16x8xf32>, vector<1x16x8xf32>, vector<1x16x16xf32> -> vector<1x16x16xf32>
    "tpu.trace_stop"() : () -> ()
    %c0_7 = arith.constant 0 : index
    %c0_8 = arith.constant 0 : index
    %c0_9 = arith.constant 0 : index
    %15 = vector.load %arg6[%c0_7, %c0_8, %c0_9] : memref<4x16x16xf32, #tpu.memory_space<vmem>>, vector<1x16x16xf32>
    %16 = vector.shape_cast %15 : vector<1x16x16xf32> to vector<16x16xf32>
    %17 = vector.shape_cast %16 : vector<16x16xf32> to vector<1x16x16xf32>
    %18 = arith.addf %14, %17 : vector<1x16x16xf32>
    %cst_10 = arith.constant dense<0xFF800000> : vector<1x16xf32>
    %19 = vector.multi_reduction <maximumf>, %18, %cst_10 [2] : vector<1x16x16xf32> to vector<1x16xf32>
    %20 = vector.shape_cast %19 : vector<1x16xf32> to vector<1x16x1xf32>
    %21 = vector.broadcast %20 : vector<1x16x1xf32> to vector<1x16x16xf32>
    %22 = arith.subf %18, %21 : vector<1x16x16xf32>
    %23 = math.exp %22 : vector<1x16x16xf32>
    %cst_11 = arith.constant dense<0.000000e+00> : vector<1x16xf32>
    %24 = vector.multi_reduction <add>, %23, %cst_11 [2] : vector<1x16x16xf32> to vector<1x16xf32>
    %25 = vector.shape_cast %24 : vector<1x16xf32> to vector<1x16x1xf32>
    "tpu.trace_start"() <{level = 10 : i32, message = "bqk,bkd->bqd"}> : () -> ()
    %cst_12 = arith.constant dense<0.000000e+00> : vector<1x16x8xf32>
    %26 = tpu.matmul %23, %13, %cst_12 {dimension_numbers = #tpu.dot_dimension_numbers<[2], [1], [1], [2], [0, 0, 0, 1, 1, 2], [0], [0]>} : vector<1x16x16xf32>, vector<1x16x8xf32>, vector<1x16x8xf32> -> vector<1x16x8xf32>
    "tpu.trace_stop"() : () -> ()
    %27 = tpu.reciprocal %25 {approx = true} : vector<1x16x1xf32> -> vector<1x16x1xf32>
    %28 = arith.mulf %25, %27 : vector<1x16x1xf32>
    %cst_13 = arith.constant 2.000000e+00 : f32
    %29 = vector.broadcast %cst_13 : f32 to vector<1x16x1xf32>
    %30 = arith.subf %29, %28 : vector<1x16x1xf32>
    %31 = arith.mulf %27, %30 : vector<1x16x1xf32>
    %32 = vector.broadcast %31 : vector<1x16x1xf32> to vector<1x16x8xf32>
    %33 = arith.mulf %26, %32 : vector<1x16x8xf32>
    %34 = vector.shape_cast %33 : vector<1x16x8xf32> to vector<16x8xf32>
    %c0_14 = arith.constant 0 : index
    %c0_15 = arith.constant 0 : index
    %35 = vector.load %arg8[%c0_14, %c0_15] : memref<16x32xf32, #tpu.memory_space<vmem>>, vector<16x8xf32>
    tpu.vector_store %arg8[%c0_14, %c0_15], %34 {strides = array<i32>} : memref<16x32xf32, #tpu.memory_space<vmem>>, vector<16x8xf32>,
    %36 = vector.extract_strided_slice %5 {offsets = [0, 8], sizes = [16, 8], strides = [1, 1]} : vector<16x96xf32> to vector<16x8xf32>
    %cst_16 = arith.constant 0.353553385 : f32
    %37 = vector.broadcast %cst_16 : f32 to vector<16x8xf32>
    %38 = arith.mulf %36, %37 : vector<16x8xf32>
    %39 = vector.shape_cast %38 : vector<16x8xf32> to vector<1x16x8xf32>
    %40 = vector.extract_strided_slice %5 {offsets = [0, 40], sizes = [16, 8], strides = [1, 1]} : vector<16x96xf32> to vector<16x8xf32>
    %41 = vector.shape_cast %40 : vector<16x8xf32> to vector<1x16x8xf32>
    %42 = vector.extract_strided_slice %5 {offsets = [0, 72], sizes = [16, 8], strides = [1, 1]} : vector<16x96xf32> to vector<16x8xf32>
    %43 = vector.shape_cast %42 : vector<16x8xf32> to vector<1x16x8xf32>
    "tpu.trace_start"() <{level = 10 : i32, message = "bqd,bkd->bqk"}> : () -> ()
    %cst_17 = arith.constant dense<0.000000e+00> : vector<1x16x16xf32>
    %44 = tpu.matmul %39, %41, %cst_17 {dimension_numbers = #tpu.dot_dimension_numbers<[2], [2], [1], [1], [0, 0, 0, 1, 1, 1], [0], [0]>} : vector<1x16x8xf32>, vector<1x16x8xf32>, vector<1x16x16xf32> -> vector<1x16x16xf32>
    "tpu.trace_stop"() : () -> ()
    %c1 = arith.constant 1 : index
    %c0_18 = arith.constant 0 : index
    %c0_19 = arith.constant 0 : index
    %45 = vector.load %arg6[%c1, %c0_18, %c0_19] : memref<4x16x16xf32, #tpu.memory_space<vmem>>, vector<1x16x16xf32>
    %46 = vector.shape_cast %45 : vector<1x16x16xf32> to vector<16x16xf32>
    %47 = vector.shape_cast %46 : vector<16x16xf32> to vector<1x16x16xf32>
    %48 = arith.addf %44, %47 : vector<1x16x16xf32>
    %cst_20 = arith.constant dense<0xFF800000> : vector<1x16xf32>
    %49 = vector.multi_reduction <maximumf>, %48, %cst_20 [2] : vector<1x16x16xf32> to vector<1x16xf32>
    %50 = vector.shape_cast %49 : vector<1x16xf32> to vector<1x16x1xf32>
    %51 = vector.broadcast %50 : vector<1x16x1xf32> to vector<1x16x16xf32>
    %52 = arith.subf %48, %51 : vector<1x16x16xf32>
    %53 = math.exp %52 : vector<1x16x16xf32>
    %cst_21 = arith.constant dense<0.000000e+00> : vector<1x16xf32>
    %54 = vector.multi_reduction <add>, %53, %cst_21 [2] : vector<1x16x16xf32> to vector<1x16xf32>
    %55 = vector.shape_cast %54 : vector<1x16xf32> to vector<1x16x1xf32>
    "tpu.trace_start"() <{level = 10 : i32, message = "bqk,bkd->bqd"}> : () -> ()
    %cst_22 = arith.constant dense<0.000000e+00> : vector<1x16x8xf32>
    %56 = tpu.matmul %53, %43, %cst_22 {dimension_numbers = #tpu.dot_dimension_numbers<[2], [1], [1], [2], [0, 0, 0, 1, 1, 2], [0], [0]>} : vector<1x16x16xf32>, vector<1x16x8xf32>, vector<1x16x8xf32> -> vector<1x16x8xf32>
    "tpu.trace_stop"() : () -> ()
    %57 = tpu.reciprocal %55 {approx = true} : vector<1x16x1xf32> -> vector<1x16x1xf32>
    %58 = arith.mulf %55, %57 : vector<1x16x1xf32>
    %cst_23 = arith.constant 2.000000e+00 : f32
    %59 = vector.broadcast %cst_23 : f32 to vector<1x16x1xf32>
    %60 = arith.subf %59, %58 : vector<1x16x1xf32>
    %61 = arith.mulf %57, %60 : vector<1x16x1xf32>
    %62 = vector.broadcast %61 : vector<1x16x1xf32> to vector<1x16x8xf32>
    %63 = arith.mulf %56, %62 : vector<1x16x8xf32>
    %64 = vector.shape_cast %63 : vector<1x16x8xf32> to vector<16x8xf32>
    %c0_24 = arith.constant 0 : index
    %c8 = arith.constant 8 : index
    %65 = vector.load %arg8[%c0_24, %c8] : memref<16x32xf32, #tpu.memory_space<vmem>>, vector<16x8xf32>
    tpu.vector_store %arg8[%c0_24, %c8], %64 {strides = array<i32>} : memref<16x32xf32, #tpu.memory_space<vmem>>, vector<16x8xf32>,
    %66 = vector.extract_strided_slice %5 {offsets = [0, 16], sizes = [16, 8], strides = [1, 1]} : vector<16x96xf32> to vector<16x8xf32>
    %cst_25 = arith.constant 0.353553385 : f32
    %67 = vector.broadcast %cst_25 : f32 to vector<16x8xf32>
    %68 = arith.mulf %66, %67 : vector<16x8xf32>
    %69 = vector.shape_cast %68 : vector<16x8xf32> to vector<1x16x8xf32>
    %70 = vector.extract_strided_slice %5 {offsets = [0, 48], sizes = [16, 8], strides = [1, 1]} : vector<16x96xf32> to vector<16x8xf32>
    %71 = vector.shape_cast %70 : vector<16x8xf32> to vector<1x16x8xf32>
    %72 = vector.extract_strided_slice %5 {offsets = [0, 80], sizes = [16, 8], strides = [1, 1]} : vector<16x96xf32> to vector<16x8xf32>
    %73 = vector.shape_cast %72 : vector<16x8xf32> to vector<1x16x8xf32>
    "tpu.trace_start"() <{level = 10 : i32, message = "bqd,bkd->bqk"}> : () -> ()
    %cst_26 = arith.constant dense<0.000000e+00> : vector<1x16x16xf32>
    %74 = tpu.matmul %69, %71, %cst_26 {dimension_numbers = #tpu.dot_dimension_numbers<[2], [2], [1], [1], [0, 0, 0, 1, 1, 1], [0], [0]>} : vector<1x16x8xf32>, vector<1x16x8xf32>, vector<1x16x16xf32> -> vector<1x16x16xf32>
    "tpu.trace_stop"() : () -> ()
    %c2 = arith.constant 2 : index
    %c0_27 = arith.constant 0 : index
    %c0_28 = arith.constant 0 : index
    %75 = vector.load %arg6[%c2, %c0_27, %c0_28] : memref<4x16x16xf32, #tpu.memory_space<vmem>>, vector<1x16x16xf32>
    %76 = vector.shape_cast %75 : vector<1x16x16xf32> to vector<16x16xf32>
    %77 = vector.shape_cast %76 : vector<16x16xf32> to vector<1x16x16xf32>
    %78 = arith.addf %74, %77 : vector<1x16x16xf32>
    %cst_29 = arith.constant dense<0xFF800000> : vector<1x16xf32>
    %79 = vector.multi_reduction <maximumf>, %78, %cst_29 [2] : vector<1x16x16xf32> to vector<1x16xf32>
    %80 = vector.shape_cast %79 : vector<1x16xf32> to vector<1x16x1xf32>
    %81 = vector.broadcast %80 : vector<1x16x1xf32> to vector<1x16x16xf32>
    %82 = arith.subf %78, %81 : vector<1x16x16xf32>
    %83 = math.exp %82 : vector<1x16x16xf32>
    %cst_30 = arith.constant dense<0.000000e+00> : vector<1x16xf32>
    %84 = vector.multi_reduction <add>, %83, %cst_30 [2] : vector<1x16x16xf32> to vector<1x16xf32>
    %85 = vector.shape_cast %84 : vector<1x16xf32> to vector<1x16x1xf32>
    "tpu.trace_start"() <{level = 10 : i32, message = "bqk,bkd->bqd"}> : () -> ()
    %cst_31 = arith.constant dense<0.000000e+00> : vector<1x16x8xf32>
    %86 = tpu.matmul %83, %73, %cst_31 {dimension_numbers = #tpu.dot_dimension_numbers<[2], [1], [1], [2], [0, 0, 0, 1, 1, 2], [0], [0]>} : vector<1x16x16xf32>, vector<1x16x8xf32>, vector<1x16x8xf32> -> vector<1x16x8xf32>
    "tpu.trace_stop"() : () -> ()
    %87 = tpu.reciprocal %85 {approx = true} : vector<1x16x1xf32> -> vector<1x16x1xf32>
    %88 = arith.mulf %85, %87 : vector<1x16x1xf32>
    %cst_32 = arith.constant 2.000000e+00 : f32
    %89 = vector.broadcast %cst_32 : f32 to vector<1x16x1xf32>
    %90 = arith.subf %89, %88 : vector<1x16x1xf32>
    %91 = arith.mulf %87, %90 : vector<1x16x1xf32>
    %92 = vector.broadcast %91 : vector<1x16x1xf32> to vector<1x16x8xf32>
    %93 = arith.mulf %86, %92 : vector<1x16x8xf32>
    %94 = vector.shape_cast %93 : vector<1x16x8xf32> to vector<16x8xf32>
    %c0_33 = arith.constant 0 : index
    %c16 = arith.constant 16 : index
    %95 = vector.load %arg8[%c0_33, %c16] : memref<16x32xf32, #tpu.memory_space<vmem>>, vector<16x8xf32>
    tpu.vector_store %arg8[%c0_33, %c16], %94 {strides = array<i32>} : memref<16x32xf32, #tpu.memory_space<vmem>>, vector<16x8xf32>,
    %96 = vector.extract_strided_slice %5 {offsets = [0, 24], sizes = [16, 8], strides = [1, 1]} : vector<16x96xf32> to vector<16x8xf32>
    %cst_34 = arith.constant 0.353553385 : f32
    %97 = vector.broadcast %cst_34 : f32 to vector<16x8xf32>
    %98 = arith.mulf %96, %97 : vector<16x8xf32>
    %99 = vector.shape_cast %98 : vector<16x8xf32> to vector<1x16x8xf32>
    %100 = vector.extract_strided_slice %5 {offsets = [0, 56], sizes = [16, 8], strides = [1, 1]} : vector<16x96xf32> to vector<16x8xf32>
    %101 = vector.shape_cast %100 : vector<16x8xf32> to vector<1x16x8xf32>
    %102 = vector.extract_strided_slice %5 {offsets = [0, 88], sizes = [16, 8], strides = [1, 1]} : vector<16x96xf32> to vector<16x8xf32>
    %103 = vector.shape_cast %102 : vector<16x8xf32> to vector<1x16x8xf32>
    "tpu.trace_start"() <{level = 10 : i32, message = "bqd,bkd->bqk"}> : () -> ()
    %cst_35 = arith.constant dense<0.000000e+00> : vector<1x16x16xf32>
    %104 = tpu.matmul %99, %101, %cst_35 {dimension_numbers = #tpu.dot_dimension_numbers<[2], [2], [1], [1], [0, 0, 0, 1, 1, 1], [0], [0]>} : vector<1x16x8xf32>, vector<1x16x8xf32>, vector<1x16x16xf32> -> vector<1x16x16xf32>
    "tpu.trace_stop"() : () -> ()
    %c3 = arith.constant 3 : index
    %c0_36 = arith.constant 0 : index
    %c0_37 = arith.constant 0 : index
    %105 = vector.load %arg6[%c3, %c0_36, %c0_37] : memref<4x16x16xf32, #tpu.memory_space<vmem>>, vector<1x16x16xf32>
    %106 = vector.shape_cast %105 : vector<1x16x16xf32> to vector<16x16xf32>
    %107 = vector.shape_cast %106 : vector<16x16xf32> to vector<1x16x16xf32>
    %108 = arith.addf %104, %107 : vector<1x16x16xf32>
    %cst_38 = arith.constant dense<0xFF800000> : vector<1x16xf32>
    %109 = vector.multi_reduction <maximumf>, %108, %cst_38 [2] : vector<1x16x16xf32> to vector<1x16xf32>
    %110 = vector.shape_cast %109 : vector<1x16xf32> to vector<1x16x1xf32>
    %111 = vector.broadcast %110 : vector<1x16x1xf32> to vector<1x16x16xf32>
    %112 = arith.subf %108, %111 : vector<1x16x16xf32>
    %113 = math.exp %112 : vector<1x16x16xf32>
    %cst_39 = arith.constant dense<0.000000e+00> : vector<1x16xf32>
    %114 = vector.multi_reduction <add>, %113, %cst_39 [2] : vector<1x16x16xf32> to vector<1x16xf32>
    %115 = vector.shape_cast %114 : vector<1x16xf32> to vector<1x16x1xf32>
    "tpu.trace_start"() <{level = 10 : i32, message = "bqk,bkd->bqd"}> : () -> ()
    %cst_40 = arith.constant dense<0.000000e+00> : vector<1x16x8xf32>
    %116 = tpu.matmul %113, %103, %cst_40 {dimension_numbers = #tpu.dot_dimension_numbers<[2], [1], [1], [2], [0, 0, 0, 1, 1, 2], [0], [0]>} : vector<1x16x16xf32>, vector<1x16x8xf32>, vector<1x16x8xf32> -> vector<1x16x8xf32>
    "tpu.trace_stop"() : () -> ()
    %117 = tpu.reciprocal %115 {approx = true} : vector<1x16x1xf32> -> vector<1x16x1xf32>
    %118 = arith.mulf %115, %117 : vector<1x16x1xf32>
    %cst_41 = arith.constant 2.000000e+00 : f32
    %119 = vector.broadcast %cst_41 : f32 to vector<1x16x1xf32>
    %120 = arith.subf %119, %118 : vector<1x16x1xf32>
    %121 = arith.mulf %117, %120 : vector<1x16x1xf32>
    %122 = vector.broadcast %121 : vector<1x16x1xf32> to vector<1x16x8xf32>
    %123 = arith.mulf %116, %122 : vector<1x16x8xf32>
    %124 = vector.shape_cast %123 : vector<1x16x8xf32> to vector<16x8xf32>
    %c0_42 = arith.constant 0 : index
    %c24 = arith.constant 24 : index
    %125 = vector.load %arg8[%c0_42, %c24] : memref<16x32xf32, #tpu.memory_space<vmem>>, vector<16x8xf32>
    tpu.vector_store %arg8[%c0_42, %c24], %124 {strides = array<i32>} : memref<16x32xf32, #tpu.memory_space<vmem>>, vector<16x8xf32>,
    %c0_43 = arith.constant 0 : index
    %c0_44 = arith.constant 0 : index
    %126 = vector.load %arg8[%c0_43, %c0_44] : memref<16x32xf32, #tpu.memory_space<vmem>>, vector<16x32xf32>
    %c0_45 = arith.constant 0 : index
    %c0_46 = arith.constant 0 : index
    %127 = vector.load %arg4[%c0_45, %c0_46] : memref<32x32xf32, #tpu.memory_space<vmem>>, vector<32x32xf32>
    %cst_47 = arith.constant dense<0.000000e+00> : vector<16x32xf32>
    %128 = tpu.matmul %126, %127, %cst_47 {dimension_numbers = #tpu.dot_dimension_numbers<[1], [0], [0], [1], [0, 0, 1, 1], [], []>} : vector<16x32xf32>, vector<32x32xf32>, vector<16x32xf32> -> vector<16x32xf32>
    %c0_48 = arith.constant 0 : index
    %c0_49 = arith.constant 0 : index
    %129 = vector.load %arg5[%c0_48, %c0_49] : memref<1x32xf32, #tpu.memory_space<vmem>>, vector<1x32xf32>
    %130 = vector.broadcast %129 : vector<1x32xf32> to vector<16x32xf32>
    %131 = arith.addf %128, %130 : vector<16x32xf32>
    %c0_50 = arith.constant 0 : index
    %c0_51 = arith.constant 0 : index
    %132 = vector.load %arg7[%c0_50, %c0_51] : memref<16x32xf32, #tpu.memory_space<vmem>>, vector<16x32xf32>
    tpu.vector_store %arg7[%c0_50, %c0_51], %131 {strides = array<i32>} : memref<16x32xf32, #tpu.memory_space<vmem>>, vector<16x32xf32>,
    return
  }
  func.func @transform_0(%arg0: i32) -> (i32, i32) {
    %c0_i32 = arith.constant 0 : i32
    %c0_i32_0 = arith.constant 0 : i32
    return %arg0, %c0_i32 : i32, i32
  }
  func.func @transform_1(%arg0: i32) -> (i32, i32) {
    %c0_i32 = arith.constant 0 : i32
    %c0_i32_0 = arith.constant 0 : i32
    %c0_i32_1 = arith.constant 0 : i32
    return %c0_i32, %c0_i32_0 : i32, i32
  }
  func.func @transform_2(%arg0: i32) -> (i32, i32) {
    %c0_i32 = arith.constant 0 : i32
    %c0_i32_0 = arith.constant 0 : i32
    %c0_i32_1 = arith.constant 0 : i32
    return %c0_i32, %c0_i32_0 : i32, i32
  }
  func.func @transform_3(%arg0: i32) -> (i32, i32) {
    %c0_i32 = arith.constant 0 : i32
    %c0_i32_0 = arith.constant 0 : i32
    %c0_i32_1 = arith.constant 0 : i32
    return %c0_i32, %c0_i32_0 : i32, i32
  }
  func.func @transform_4(%arg0: i32) -> (i32, i32) {
    %c0_i32 = arith.constant 0 : i32
    %c0_i32_0 = arith.constant 0 : i32
    %c0_i32_1 = arith.constant 0 : i32
    return %c0_i32, %c0_i32_0 : i32, i32
  }
  func.func @transform_5(%arg0: i32) -> (i32, i32, i32) {
    %c0_i32 = arith.constant 0 : i32
    %c0_i32_0 = arith.constant 0 : i32
    %c0_i32_1 = arith.constant 0 : i32
    %c0_i32_2 = arith.constant 0 : i32
    return %c0_i32, %c0_i32_0, %c0_i32_1 : i32, i32, i32
  }
  func.func @transform_6(%arg0: i32) -> (i32, i32) {
    %c0_i32 = arith.constant 0 : i32
    %c0_i32_0 = arith.constant 0 : i32
    return %arg0, %c0_i32 : i32, i32
  }
}

</mosaic_0001>

<bundles_post_ra>
// kernel: tpu_custom_call.1
= control target key start
LH: loop header
LB: loop body
LE: loop exit
PB: predicated region body
PF: predicated region fallthrough
CT: control target
= control target key end

     0   :  { %s1034_s21 = smov 0   ;;  %s1184_s0 = inlined_call_operand.vmem [shape: f32[128,32], index: 0, kind: input, shape index: {}]   ;;  %s1185_s1 = inlined_call_operand.vmem [shape: f32[32,96], index: 1, kind: input, shape index: {}]   ;;  %s1186_s2 = inlined_call_operand.vmem [shape: f32[1,96], index: 2, kind: input, shape index: {}]   ;;  %s1187_s3 = inlined_call_operand.vmem [shape: f32[32,32], index: 3, kind: input, shape index: {}]   ;;  %s1188_s4 = inlined_call_operand.vmem [shape: f32[1,32], index: 4, kind: input, shape index: {}]   ;;  %s1189_s5 = inlined_call_operand.vmem [shape: f32[4,16,16], index: 5, kind: input, shape index: {}]   ;;  %s1190_s6 = inlined_call_operand.vmem [shape: f32[128,32], index: 6, kind: output, shape index: {}]  }
   0x1 LB: > { %s850_s22 = sadd.s32 4294967295, %s983_s21   ;;  %p854_p0 = scmp.ge.s32.totalorder %s983_s21, 1  ;;  %s983_s21 = sphi %s1034_s21, %s16_s21  }
   0x2   : > { %p213_p1 = scmp.lt.s32.totalorder %s983_s21, 9 }
   0x4   : > { %p214_p2 = pnand %p854_p0, %p213_p1 }
   0x5   : > { %s855_s27 = sshll.u32 (!%p214_p2), %s850_s22, 1  ;;  %s985_s14 = smov (!%p214_p2), 88  }
   0x6   : > { %217 = sbr.rel (%p214_p2) target bundleno = 1273 (0x4f9), region = 44  ;;  %p244_p3 = scmp.lt.s32.totalorder (!%p214_p2), %s855_s27, 15 }
   0x7   : > { %s986_s15 = smov (!%p214_p2), 96   ;;  %s987_s16 = smov (!%p214_p2), 120  }
   0x8   : > { %s988_s17 = smov (!%p214_p2), 72   ;;  %s989_s18 = smov (!%p214_p2), 80  }
   0x9   : > { %s990_s19 = smov (!%p214_p2), 104   ;;  %s991_s20 = smov (!%p214_p2), 112  }
   0xa   : > { %s992_s22 = smov (!%p214_p2), 56   ;;  %s993_s28 = smov (!%p214_p2), 64  }
   0xb   : > { %v260_v0 = vld [vmem:[%s1185_s1 + $0x18] sm:$0xff]  ;;  %v259_v1 = vld [vmem:[%s1185_s1 + $0x10] sm:$0xff]  ;;  %v258_v2 = vld [vmem:[%s1185_s1 + $0x8] sm:$0xff]  ;;  %s1192_s27 = smov (!%p244_p3, %s855_s27), 15  ;;  %vm265_vm0 = vcmask 261120   ;;  %vm305_vm1 = vcmask 64512  }
   0xc   : > { %284 = vmatpush.msra.mxu0 %v260_v0  ;;  %895 = vmatpush.msra.mxu1 %v260_v0  ;;  %v257_v3 = vld [vmem:[%s1185_s1] sm:$0xff]  ;;  %s856_s8 = sshll.u32 %s1192_s27, 3  ;;  %vm339_vm2 = vcmask 130048   ;;  %v298_v25 = vld [vmem:[%s1189_s5 + $0x8] sm:$0xff]  ;;  %v867_v55 = vld [vmem:[%s1189_s5 + $0x10] sm:$0xff]  ;;  %s998_s23 = smov 24  }
   0xd   : > { %s247_s11 = scalar_lea.vmem %s1184_s0, %s856_s8  ;;  %v943_v6 = vld [vmem:[%s1186_s2] ss:$0 sm:$0xff]  ;;  %v868_v59 = vld [vmem:[%s1189_s5 + $0x18] sm:$0xff]  ;;  %v883_v63 = vld [vmem:[%s1189_s5 + $0x30] sm:$0xff]  ;;  %vm518_vm3 = vcmask 130112   ;;  %vm634_vm4 = vcmask 195712  }
   0xe   : > { %285 = vmatpush.msra.mxu0 %v259_v1  ;;  %896 = vmatpush.msra.mxu1 %v259_v1  ;;  %v255_v4 = vld [vmem:[%s247_s11] sm:$0xff]  ;;  %v256_v5 = vld [vmem:[%s247_s11 + $0x8] sm:$0xff]  ;;  %vm750_vm5 = vcmask 261312  }
   0xf   : > { %v297_v21 = vld [vmem:[%s1189_s5] sm:$0xff] }
  0x10   : > { %286 = vmatpush.msra.mxu0 %v258_v2  ;;  %897 = vmatpush.msra.mxu1 %v258_v2  ;;  %v875_v50 = vld [vmem:[%s1189_s5 + $0x20] sm:$0xff] }
  0x12   : > { %287 = vmatpush.msra.mxu0 %v257_v3  ;;  %898 = vmatpush.msra.mxu1 %v257_v3  ;;  %v884_v3 = vld [vmem:[%s1189_s5 + $0x38] sm:$0xff] }
  0x13   : > { %859 = vmatmul.msk.f32.vlgmr.msra.gmra.mxu0 %vm265_vm0, %v255_v4  ;;  %860 = vmatmul.msk.f32.vlgmr.msra.gmra.mxu1 %vm265_vm0, %v256_v5 }
  0x90   : > { %v292_v7 = vpop.f32.mrf.mxu1  ;;  %v289_v9 = vpop.f32.mrf.mxu0 }
  0x91   : > { %v293_v8 = vadd.f32 %v943_v6, %v292_v7  ;;  %v290_v10 = vadd.f32 %v943_v6, %v289_v9  ;;  %v876_v7 = vld [vmem:[%s1189_s5 + $0x28] sm:$0xff] }
  0x93   : > { %414 = vrot.lane.b32.xlu2 %v293_v8, %s985_s14  ;;  %303 = vrot.lane.b32.xlu0 %v293_v8, %s986_s15  ;;  %v296_v11 = vmul.f32 0.35355338, %v293_v8  ;;  %v295_v12 = vmul.f32 0.35355338, %v290_v10  ;;  %v1069_v13 = vpack.i.bf16 %v290_v10, %v293_v8 }
  0x9b   : > { %412 = vrot.lane.b32.xlu2 %v290_v10, %s985_s14  ;;  %301 = vrot.lane.b32.xlu0 %v290_v10, %s986_s15  ;;  %s253_s14 = scalar_lea.vmem %s1190_s6, %s856_s8 }
  0xa3   : > { %410 = vrot.lane.b32.xlu2 %v296_v11, %s987_s16  ;;  %408 = vrot.lane.b32.xlu0 %v295_v12, %s987_s16 }
  0xab   : > { %644 = vrot.lane.b32.xlu2 %v290_v10, %s988_s17  ;;  %646 = vrot.lane.b32.xlu0 %v293_v8, %s988_s17 }
  0xb3   : > { %530 = vrot.lane.b32.xlu2 %v293_v8, %s989_s18  ;;  %640 = vrot.lane.b32.xlu0 %v295_v12, %s990_s19 }
  0xbb   : > { %524 = vrot.lane.b32.xlu2 %v295_v12, %s991_s20  ;;  %642 = vrot.lane.b32.xlu0 %v296_v11, %s990_s19  ;;  %s995_s19 = smov 40  }
  0xc3   : > { %929 = vrot.lane.b32.xlu2 %v1069_v13, %s992_s22  ;;  %s997_s22 = smov 8  }
  0xed   : > { %v415_v14 = vpop.permute.xlu2 %414 }
  0xf5   : > { %v413_v15 = vpop.permute.xlu2 %412 }
  0xfd   : > { %v1072_v16 = vpop.permute.xlu2 %410 }
 0x105   : > { %v304_v17 = vpop.permute.xlu0 %303  ;;  %v645_v18 = vpop.permute.xlu2 %644 }
 0x106   : > { %861 = vmatpush.xpose.msk.msrb.mxu1 %vm305_vm1, %v304_v17 }
 0x10d   : > { %v531_v19 = vpop.permute.xlu2 %530  ;;  %v302_v20 = vpop.permute.xlu0 %301 }
 0x10e   : > { %862 = vmatpush.xpose.msk.msrb.mxu1 %vm305_vm1, %v302_v20  ;;  %877 = vmatpush.xpose.msk.msrb.mxu0 %vm305_vm1, %v531_v19 }
 0x111   : > { %863 = vmatmul.msk.f32.vlgmr.msrb.gmra.mxu1 %vm305_vm1, %v295_v12 }
 0x115   : > { %v409_v29 = vpop.permute.xlu0 %408  ;;  %v525_v37 = vpop.permute.xlu2 %524 }
 0x119   : > { %864 = vmatmul.msk.f32.gmra.mxu1 %vm305_vm1, %v296_v11 }
 0x11d   : > { %v647_v30 = vpop.permute.xlu0 %646  ;;  %v930_v42 = vpop.permute.xlu2 %929 }
 0x11e   : > { %v931_v46 = vunpack.i.l.bf16 %v930_v42  ;;  %v932_v47 = vunpack.i.h.bf16 %v930_v42 }
 0x125   : > { %v641_v31 = vpop.permute.xlu0 %640 }
 0x12d   : > { %v643_v32 = vpop.permute.xlu0 %642 }
 0x18e   : > { %v333_v22 = vpop.f32.mrf.mxu1 }
 0x18f   : > { %v334_v23 = vadd.f32 %v333_v22, %v297_v21 }
 0x191   : > { %v340_v24 = vsel %vm339_vm2, %v334_v23, -inf }
 0x192   : > { %341 = vmax.xlane.f32.xlu0 %v340_v24 }
 0x196   : > { %v336_v26 = vpop.f32.mrf.mxu1 }
 0x197   : > { %v337_v27 = vadd.f32 %v336_v26, %v298_v25 }
 0x199   : > { %v343_v28 = vsel %vm339_vm2, %v337_v27, -inf }
 0x19a   : > { %344 = vmax.xlane.f32.xlu1 %v343_v28 }
 0x1b3   : > { %924 = vrot.lane.b32.xlu1 %v1069_v13, %s993_s28 }
 0x1bb   : > { %528 = vrot.lane.b32.xlu1 %v290_v10, %s989_s18  ;;  %s994_s18 = smov 48  }
 0x1c3   : > { %526 = vrot.lane.b32.xlu1 %v296_v11, %s991_s20  ;;  %s996_s20 = smov 16  }
 0x205   : > { %v342_v33 = vpop.xlane.xlu0 %341 }
 0x206   : > { %v346_v35 = vsub.f32 %v334_v23, %v342_v33 }
 0x208   : > { %v348_v38 = vmul.f32 1.442695, %v346_v35 }
 0x20a   : > { %945 = vpow2.f32 %v348_v38 }
 0x20d   : > { %v345_v34 = vpop.xlane.xlu1 %344 }
 0x20e   : > { %v347_v36 = vsub.f32 %v337_v27, %v345_v34 }
 0x210   : > { %v350_v39 = vmul.f32 1.442695, %v347_v36  ;;  %v1090_v44 = vpop.eup %945 }
 0x212   : > { %947 = vpow2.f32 %v350_v39 }
 0x218   : > { %v1092_v45 = vpop.eup %947 }
 0x225   : > { %v925_v40 = vpop.permute.xlu1 %924 }
 0x226   : > { %v926_v41 = vunpack.i.l.bf16 %v925_v40  ;;  %v927_v43 = vunpack.i.h.bf16 %v925_v40 }
 0x228   : > { %384 = vmatpush.msra.mxu2 %v926_v41  ;;  %899 = vmatpush.msra.mxu3 %v926_v41 }
 0x22a   : > { %385 = vmatpush.msra.mxu2 %v927_v43  ;;  %900 = vmatpush.msra.mxu3 %v927_v43 }
 0x22b   : > { %865 = vmatmul.msk.f32.vlgmr.msra.gmra.mxu2 %vm339_vm2, %v1090_v44  ;;  %866 = vmatmul.msk.f32.vlgmr.msra.gmra.mxu3 %vm339_vm2, %v1092_v45 }
 0x22c   : > { %869 = vmatpush.xpose.msk.msrb.mxu3 %vm305_vm1, %v415_v14  ;;  %491 = vmatpush.msrb.mxu2 %v931_v46 }
 0x22d   : > { %v529_v48 = vpop.permute.xlu1 %528 }
 0x22e   : > { %492 = vmatpush.msrb.mxu2 %v932_v47  ;;  %878 = vmatpush.xpose.msk.msrb.mxu0 %vm305_vm1, %v529_v48  ;;  %v352_v47 = vsel %vm339_vm2, %v1090_v44, 0.0  ;;  %v355_v48 = vsel %vm339_vm2, %v1092_v45, 0.0 }
 0x230   : > { %870 = vmatpush.xpose.msk.msrb.mxu3 %vm305_vm1, %v413_v15 }
 0x231   : > { %879 = vmatmul.msk.f32.vlgmr.msrb.gmra.mxu0 %vm305_vm1, %v525_v37 }
 0x233   : > { %871 = vmatmul.msk.f32.vlgmr.msrb.gmra.mxu3 %vm305_vm1, %v409_v29 }
 0x234   : > { %885 = vmatpush.xpose.msk.msra.mxu3 %vm305_vm1, %v647_v30 }
 0x235   : > { %v527_v49 = vpop.permute.xlu1 %526 }
 0x238   : > { %886 = vmatpush.xpose.msk.msra.mxu3 %vm305_vm1, %v645_v18 }
 0x239   : > { %880 = vmatmul.msk.f32.gmra.mxu0 %vm305_vm1, %v527_v49 }
 0x23b   : > { %872 = vmatmul.msk.f32.gmra.mxu3 %vm305_vm1, %v1072_v16 }
 0x243   : > { %887 = vmatmul.msk.f32.vlgmr.msra.gmra.mxu3 %vm305_vm1, %v641_v31 }
 0x24b   : > { %888 = vmatmul.msk.f32.gmra.mxu3 %vm305_vm1, %v643_v32 }
 0x2ae   : > { %v1113_v51 = vpop.f32.mrf.mxu3  ;;  %v557_v52 = vpop.f32.mrf.mxu0 }
 0x2af   : > { %v558_v53 = vadd.f32 %v875_v50, %v557_v52  ;;  %v387_v44 = vpop.f32.mrf.mxu2 }
 0x2b1   : > { %v563_v54 = vsel %vm339_vm2, %v558_v53, -inf }
 0x2b2   : > { %564 = vmax.xlane.f32.xlu1 %v563_v54 }
 0x2b6   : > { %v441_v56 = vpop.f32.mrf.mxu3  ;;  %v560_v8 = vpop.f32.mrf.mxu0 }
 0x2b7   : > { %v442_v57 = vadd.f32 %v867_v55, %v441_v56  ;;  %v561_v9 = vadd.f32 %v876_v7, %v560_v8 }
 0x2b9   : > { %v447_v58 = vsel %vm339_vm2, %v442_v57, -inf  ;;  %v566_v10 = vsel %vm339_vm2, %v561_v9, -inf }
 0x2ba   : > { %448 = vmax.xlane.f32.xlu2 %v447_v58 }
 0x2be   : > { %v444_v60 = vpop.f32.mrf.mxu3 }
 0x2bf   : > { %v445_v61 = vadd.f32 %v868_v59, %v444_v60 }
 0x2c1   : > { %v450_v62 = vsel %vm339_vm2, %v445_v61, -inf }
 0x2c2   : > { %451 = vmax.xlane.f32.xlu1 %v450_v62 }
 0x2c6   : > { %v673_v0 = vpop.f32.mrf.mxu3 }
 0x2c7   : > { %v674_v1 = vadd.f32 %v883_v63, %v673_v0 }
 0x2c9   : > { %v679_v2 = vsel %vm339_vm2, %v674_v1, -inf }
 0x2ca   : > { %680 = vmax.xlane.f32.xlu0 %v679_v2 }
 0x2ce   : > { %v676_v4 = vpop.f32.mrf.mxu3 }
 0x2cf   : > { %v677_v5 = vadd.f32 %v884_v3, %v676_v4 }
 0x2d1   : > { %v682_v6 = vsel %vm339_vm2, %v677_v5, -inf }
 0x2d2   : > { %939 = vrot.lane.b32.xlu2 %v1069_v13, %s994_s18  ;;  %683 = vmax.xlane.f32.xlu0 %v682_v6 }
 0x2da   : > { %567 = vmax.xlane.f32.xlu0 %v566_v10 }
 0x2db   : > { %934 = vrot.lane.b32.xlu1 %v1069_v13, %s995_s19 }
 0x325   : > { %v565_v11 = vpop.xlane.xlu1 %564 }
 0x326   : > { %v569_v12 = vsub.f32 %v558_v53, %v565_v11 }
 0x328   : > { %v571_v14 = vmul.f32 1.442695, %v569_v12 }
 0x32a   : > { %949 = vpow2.f32 %v571_v14 }
 0x32d   : > { %v449_v15 = vpop.xlane.xlu2 %448 }
 0x32e   : > { %v453_v16 = vsub.f32 %v442_v57, %v449_v15 }
 0x330   : > { %v455_v17 = vmul.f32 1.442695, %v453_v16  ;;  %v950_v18 = vpop.eup %949 }
 0x331   : > { %v575_v19 = vsel %vm339_vm2, %v950_v18, 0.0 }
 0x332   : > { %951 = vpow2.f32 %v455_v17  ;;  %576 = vadd.xlane.f32.xlu2 %v575_v19 }
 0x335   : > { %v452_v20 = vpop.xlane.xlu1 %451  ;;  %v940_v21 = vpop.permute.xlu2 %939 }
 0x336   : > { %v454_v22 = vsub.f32 %v445_v61, %v452_v20  ;;  %v941_v23 = vunpack.i.l.bf16 %v940_v21  ;;  %v942_v26 = vunpack.i.h.bf16 %v940_v21 }
 0x338   : > { %v952_v24 = vpop.eup %951  ;;  %v457_v25 = vmul.f32 1.442695, %v454_v22  ;;  %607 = vmatpush.msra.mxu1 %v941_v23 }
 0x339   : > { %873 = vmatmul.msk.f32.vlgmr.msrb.gmra.mxu2 %vm339_vm2, %v952_v24  ;;  %v459_v13 = vsel %vm339_vm2, %v952_v24, 0.0 }
 0x33a   : > { %953 = vpow2.f32 %v457_v25  ;;  %608 = vmatpush.msra.mxu1 %v942_v26  ;;  %460 = vadd.xlane.f32.xlu0 %v459_v13 }
 0x33b   : > { %881 = vmatmul.msk.f32.vlgmr.msra.gmra.mxu1 %vm339_vm2, %v950_v18 }
 0x33d   : > { %v681_v27 = vpop.xlane.xlu0 %680 }
 0x33e   : > { %v685_v30 = vsub.f32 %v674_v1, %v681_v27 }
 0x340   : > { %v954_v28 = vpop.eup %953  ;;  %v687_v32 = vmul.f32 1.442695, %v685_v30 }
 0x341   : > { %874 = vmatmul.msk.f32.gmra.mxu2 %vm339_vm2, %v954_v28  ;;  %v462_v29 = vsel %vm339_vm2, %v954_v28, 0.0 }
 0x342   : > { %463 = vadd.xlane.f32.xlu1 %v462_v29  ;;  %955 = vpow2.f32 %v687_v32 }
 0x345   : > { %v684_v31 = vpop.xlane.xlu0 %683 }
 0x346   : > { %v686_v33 = vsub.f32 %v677_v5, %v684_v31 }
 0x348   : > { %v689_v38 = vmul.f32 1.442695, %v686_v33  ;;  %v956_v41 = vpop.eup %955 }
 0x349   : > { %v691_v49 = vsel %vm339_vm2, %v956_v41, 0.0 }
 0x34d   : > { %v935_v34 = vpop.permute.xlu1 %934  ;;  %v568_v35 = vpop.xlane.xlu0 %567 }
 0x34e   : > { %v936_v36 = vunpack.i.l.bf16 %v935_v34  ;;  %v570_v37 = vsub.f32 %v561_v9, %v568_v35  ;;  %v937_v39 = vunpack.i.h.bf16 %v935_v34 }
 0x350   : > { %v573_v40 = vmul.f32 1.442695, %v570_v37  ;;  %723 = vmatpush.msra.mxu2 %v936_v36 }
 0x352   : > { %957 = vpow2.f32 %v573_v40  ;;  %724 = vmatpush.msra.mxu2 %v937_v39 }
 0x353   : > { %889 = vmatmul.msk.f32.vlgmr.msra.gmra.mxu2 %vm339_vm2, %v956_v41  ;;  %959 = vpow2.f32 %v689_v38  ;;  %v757_v41 = vld [vmem:[%s1187_s3 + $0x10] sm:$0xff] }
 0x358   : > { %v958_v42 = vpop.eup %957 }
 0x359   : > { %882 = vmatmul.msk.f32.gmra.mxu1 %vm339_vm2, %v958_v42  ;;  %v578_v43 = vsel %vm339_vm2, %v958_v42, 0.0  ;;  %v960_v46 = vpop.eup %959 }
 0x35a   : > { %579 = vadd.xlane.f32.xlu0 %v578_v43  ;;  %v694_v50 = vsel %vm339_vm2, %v960_v46, 0.0 }
 0x35b   : > { %890 = vmatmul.msk.f32.gmra.mxu2 %vm339_vm2, %v960_v46 }
 0x362   : > { %353 = vadd.xlane.f32.xlu0 %v352_v47 }
 0x36a   : > { %356 = vadd.xlane.f32.xlu0 %v355_v48  ;;  %v756_v48 = vld [vmem:[%s1187_s3 + $0x8] sm:$0xff] }
 0x372   : > { %692 = vadd.xlane.f32.xlu0 %v691_v49  ;;  %v755_v49 = vld [vmem:[%s1187_s3] sm:$0xff] }
 0x37a   : > { %695 = vadd.xlane.f32.xlu0 %v694_v50 }
 0x3a5   : > { %v577_v52 = vpop.xlane.xlu2 %576 }
 0x3a6   : > { %961 = vrcp.f32 %v577_v52 }
 0x3ac   : > { %v962_v53 = vpop.eup %961 }
 0x3ad   : > { %v461_v54 = vpop.xlane.xlu0 %460  ;;  %v618_v55 = vmul.f32 %v962_v53, %v577_v52 }
 0x3ae   : > { %963 = vrcp.f32 %v461_v54 }
 0x3af   : > { %v620_v56 = vsub.f32 2.0, %v618_v55  ;;  %v944_v55 = vld [vmem:[%s1188_s4] ss:$0 sm:$0xff] }
 0x3b1   : > { %v622_v60 = vmul.f32 %v962_v53, %v620_v56 }
 0x3b4   : > { %v964_v57 = vpop.eup %963 }
 0x3b5   : > { %v502_v58 = vmul.f32 %v964_v57, %v461_v54  ;;  %v464_v59 = vpop.xlane.xlu1 %463 }
 0x3b6   : > { %965 = vrcp.f32 %v464_v59 }
 0x3b7   : > { %v504_v45 = vsub.f32 2.0, %v502_v58 }
 0x3b8   : > { %v610_v61 = vpop.f32.mrf.mxu1 }
 0x3b9   : > { %v624_v62 = vmul.f32 %v622_v60, %v610_v61  ;;  %v506_v63 = vmul.f32 %v964_v57, %v504_v45 }
 0x3bb   : > { %628 = vrot.lane.b32.xlu2 %v624_v62, %s996_s20 }
 0x3bc   : > { %v966_v0 = vpop.eup %965  ;;  %v494_v1 = vpop.f32.mrf.mxu2 }
 0x3bd   : > { %v503_v2 = vmul.f32 %v966_v0, %v464_v59  ;;  %v508_v3 = vmul.f32 %v506_v63, %v494_v1 }
 0x3bf   : > { %v505_v4 = vsub.f32 2.0, %v503_v2  ;;  %512 = vrot.lane.b32.xlu0 %v508_v3, %s997_s22 }
 0x3c1   : > { %v507_v5 = vmul.f32 %v966_v0, %v505_v4 }
 0x3c4   : > { %v497_v6 = vpop.f32.mrf.mxu2 }
 0x3c5   : > { %v509_v7 = vmul.f32 %v507_v5, %v497_v6 }
 0x3c7   : > { %514 = vrot.lane.b32.xlu0 %v509_v7, %s997_s22 }
 0x3cd   : > { %v580_v8 = vpop.xlane.xlu0 %579 }
 0x3ce   : > { %967 = vrcp.f32 %v580_v8 }
 0x3d4   : > { %v968_v9 = vpop.eup %967 }
 0x3d5   : > { %v619_v10 = vmul.f32 %v968_v9, %v580_v8  ;;  %v354_v11 = vpop.xlane.xlu0 %353 }
 0x3d6   : > { %969 = vrcp.f32 %v354_v11  ;;  %v613_v15 = vpop.f32.mrf.mxu1  ;;  %v726_v32 = vpop.f32.mrf.mxu2 }
 0x3d7   : > { %v621_v12 = vsub.f32 2.0, %v619_v10 }
 0x3d9   : > { %v623_v14 = vmul.f32 %v968_v9, %v621_v12 }
 0x3db   : > { %v625_v16 = vmul.f32 %v623_v14, %v613_v15 }
 0x3dc   : > { %v970_v17 = vpop.eup %969 }
 0x3dd   : > { %v395_v18 = vmul.f32 %v970_v17, %v354_v11  ;;  %630 = vrot.lane.b32.xlu2 %v625_v16, %s996_s20  ;;  %v357_v19 = vpop.xlane.xlu0 %356 }
 0x3de   : > { %971 = vrcp.f32 %v357_v19  ;;  %v729_v39 = vpop.f32.mrf.mxu2 }
 0x3df   : > { %v397_v20 = vsub.f32 2.0, %v395_v18 }
 0x3e1   : > { %v399_v21 = vmul.f32 %v970_v17, %v397_v20 }
 0x3e3   : > { %v401_v22 = vmul.f32 %v399_v21, %v387_v44 }
 0x3e4   : > { %v972_v23 = vpop.eup %971 }
 0x3e5   : > { %v396_v24 = vmul.f32 %v972_v23, %v357_v19  ;;  %v693_v25 = vpop.xlane.xlu0 %692  ;;  %403 = vst.msk [vmem:[#allocation2] sm:$0xff] %vm305_vm1, %v401_v22 }
 0x3e6   : > { %973 = vrcp.f32 %v693_v25 }
 0x3e7   : > { %v398_v26 = vsub.f32 2.0, %v396_v24 }
 0x3e9   : > { %v400_v13 = vmul.f32 %v972_v23, %v398_v26 }
 0x3eb   : > { %v402_v27 = vmul.f32 %v400_v13, %v1113_v51  ;;  %v758_v51 = vld [vmem:[%s1187_s3 + $0x18] sm:$0xff] }
 0x3ec   : > { %v974_v28 = vpop.eup %973  ;;  %781 = vmatpush.msra.mxu0 %v758_v51 }
 0x3ed   : > { %v734_v29 = vmul.f32 %v974_v28, %v693_v25  ;;  %v696_v30 = vpop.xlane.xlu0 %695  ;;  %404 = vst.msk [vmem:[#allocation2 + $0x8] sm:$0xff] %vm305_vm1, %v402_v27 }
 0x3ee   : > { %975 = vrcp.f32 %v696_v30  ;;  %782 = vmatpush.msra.mxu0 %v757_v41 }
 0x3ef   : > { %v736_v31 = vsub.f32 2.0, %v734_v29 }
 0x3f0   : > { %783 = vmatpush.msra.mxu0 %v756_v48 }
 0x3f1   : > { %v738_v33 = vmul.f32 %v974_v28, %v736_v31 }
 0x3f2   : > { %784 = vmatpush.msra.mxu0 %v755_v49 }
 0x3f3   : > { %v740_v34 = vmul.f32 %v738_v33, %v726_v32 }
 0x3f4   : > { %v976_v35 = vpop.eup %975 }
 0x3f5   : > { %v735_v36 = vmul.f32 %v976_v35, %v696_v30  ;;  %744 = vrot.lane.b32.xlu1 %v740_v34, %s998_s23 }
 0x3f7   : > { %v737_v37 = vsub.f32 2.0, %v735_v36 }
 0x3f9   : > { %v739_v38 = vmul.f32 %v976_v35, %v737_v37 }
 0x3fb   : > { %v741_v40 = vmul.f32 %v739_v38, %v729_v39 }
 0x3fd   : > { %746 = vrot.lane.b32.xlu0 %v741_v40, %s998_s23 }
 0x415   : > { %v629_v43 = vpop.permute.xlu2 %628 }
 0x431   : > { %v513_v42 = vpop.permute.xlu0 %512 }
 0x432   : > { %519 = vst.msk [vmem:[#allocation2] sm:$0xff] %vm518_vm3, %v513_v42 }
 0x433   : > { %635 = vst.msk [vmem:[#allocation2] sm:$0xff] %vm634_vm4, %v629_v43 }
 0x437   : > { %v631_v47 = vpop.permute.xlu2 %630 }
 0x439   : > { %v515_v46 = vpop.permute.xlu0 %514 }
 0x43a   : > { %520 = vst.msk [vmem:[#allocation2 + $0x8] sm:$0xff] %vm518_vm3, %v515_v46 }
 0x43b   : > { %636 = vst.msk [vmem:[#allocation2 + $0x8] sm:$0xff] %vm634_vm4, %v631_v47 }
 0x467   : > { %v745_v50 = vpop.permute.xlu1 %744 }
 0x468   : > { %751 = vst.msk [vmem:[#allocation2] sm:$0xff] %vm750_vm5, %v745_v50 }
 0x46f   : > { %v747_v52 = vpop.permute.xlu0 %746  ;;  %v753_v53 = vld [vmem:[#allocation2] sm:$0xff] }
 0x470   : > { %752 = vst.msk [vmem:[#allocation2 + $0x8] sm:$0xff] %vm750_vm5, %v747_v52  ;;  %891 = vmatmul.msk.f32.vlgmr.msra.gmra.mxu0 %vm265_vm0, %v753_v53 }
 0x477   : > { %v754_v54 = vld [vmem:[#allocation2 + $0x8] sm:$0xff] }
 0x478   : > { %892 = vmatmul.msk.f32.gmra.mxu0 %vm265_vm0, %v754_v54 }
 0x4ed   : > { %v786_v56 = vpop.f32.mrf.mxu0 }
 0x4ee   : > { %v787_v57 = vadd.f32 %v944_v55, %v786_v56 }
 0x4f0   : > { %792 = vst.msk [vmem:[%s253_s14] sm:$0xff] %vm265_vm0, %v787_v57 }
 0x4f5   : > { %v789_v44 = vpop.f32.mrf.mxu0 }
 0x4f6   : > { %v790_v58 = vadd.f32 %v944_v55, %v789_v44 }
 0x4f8   : > { %793 = vst.msk [vmem:[%s253_s14 + $0x8] sm:$0xff] %vm265_vm0, %v790_v58 }
 0x4f9 PF: > { %s16_s21 = sadd.s32 1, %s983_s21  }
 0x4fa   : > { %p13_p4 = scmp.ge.s32.totalorder %s16_s21, 10  }
 0x4fc   :  { %15 = sbr.rel (!%p13_p4) target bundleno = 1 (0x1), region = 77 }

</bundles_post_ra>
